<compile_context>
chip_gen: v7x
topology: tpu7x:2x2x1
jax: 0.10.0
libtpu: 0.0.40
codegen_flags: <defaults>
</compile_context>

<pallas_src>
import math
import numpy as np
import jax
import jax.numpy as jnp
from jax.experimental import pallas as pl
from jax.experimental.pallas import tpu as pltpu

HIDDEN = 256     # hidden width of all three MLPs (from the module definition)
LANE = 128       # TPU lane width; OUTPUT feature dims are padded to this
TM_MAX = 1024    # max row tile for the big batched calls


def _round_up(x, m):
    return ((x + m - 1) // m) * m


def _cdiv(a, b):
    return -(-a // b)


def _pick_row_tile(m, tm_max=TM_MAX):
    """Row tile for the 1-D 'parallel' grid.

    - small M: single tile, multiple of 16 (native bf16 (16,128) tile, unmasked).
    - moderate/large M: ~ceil(M/2) rounded up to a multiple of 256 (MXU-friendly),
      capped at tm_max, so the grid has >=2 steps and both v7x TensorCores are
      used (harmless on v5e/v6e).
    """
    if m <= 256:
        return _round_up(max(m, 16), 16)
    return min(tm_max, _round_up(_cdiv(m, 2), 256))


def _pad_rows(m, tm_max=TM_MAX):
    tm = _pick_row_tile(m, tm_max)
    return tm, _round_up(m, tm)


# ----------------------------------------------------------------------------
# Pallas kernel: generic 2-layer MLP   y = relu(x @ W1 + b1) @ W2 + b2
# x, W1, W2 are bf16; both dots accumulate in f32; bias + ReLU stay in f32;
# output is cast to o_ref.dtype (bf16 for node/edge features, f32 for logits).
# ----------------------------------------------------------------------------
def _mlp2_kernel(x_ref, w1_ref, b1_ref, w2_ref, b2_ref, o_ref):
    h = jnp.dot(x_ref[...], w1_ref[...], preferred_element_type=jnp.float32)
    h = jnp.maximum(h + b1_ref[...], 0.0)                       # f32 bias + ReLU
    y = jnp.dot(h.astype(jnp.bfloat16), w2_ref[...],
                preferred_element_type=jnp.float32) + b2_ref[...]
    o_ref[...] = y.astype(o_ref.dtype)                          # lane-dense store


def mlp2(x, w1, b1, w2, b2, tm, out_dtype=jnp.bfloat16):
    """
    x  : (M_pad, D_in) bf16, M_pad % tm == 0, D_in = compact (unpadded) feature dim
    w1 : (D_in, 256) bf16,  b1 : (1, 256) f32
    w2 : (256, D_out) bf16, b2 : (1, D_out) f32   (D_out multiple of 128)
    Returns (M_pad, D_out) in out_dtype.

    Rows are tiled with a 1-D "parallel" grid (shards across v7x TensorCores);
    weight/bias BlockSpecs use constant index_maps so they stay VMEM-resident.
    """
    m_pad, d_in = x.shape
    assert m_pad % tm == 0, (m_pad, tm)
    hid = w1.shape[1]
    d_out = w2.shape[1]

    return pl.pallas_call(
        _mlp2_kernel,
        out_shape=jax.ShapeDtypeStruct((m_pad, d_out), out_dtype),
        grid=(m_pad // tm,),
        in_specs=[
            pl.BlockSpec((tm, d_in), lambda i: (i, 0)),     # row tile of x (compact D_in)
            pl.BlockSpec((d_in, hid), lambda i: (0, 0)),    # W1 (VMEM-resident)
            pl.BlockSpec((1, hid), lambda i: (0, 0)),       # b1
            pl.BlockSpec((hid, d_out), lambda i: (0, 0)),   # W2 (VMEM-resident)
            pl.BlockSpec((1, d_out), lambda i: (0, 0)),     # b2
        ],
        out_specs=pl.BlockSpec((tm, d_out), lambda i: (i, 0)),
        compiler_params=pltpu.CompilerParams(
            dimension_semantics=("parallel",),              # shard rows across v7x TCs
            vmem_limit_bytes=32 * 1024 * 1024),             # safe on v5e/v6e/v7x
    )(x, w1, b1, w2, b2)


# ----------------------------------------------------------------------------
# Parameter construction (mirrors the PyTorch __init__ inits).
# First-layer weights keep the compact input dim; second-layer output dim is
# padded to 128 lanes with exactly-zero columns (padded lanes never leak).
# ----------------------------------------------------------------------------
def kaiming_linear(key, in_f, out_f, out_pad):
    # nn.init.kaiming_normal_ on nn.Linear.weight (shape (out,in)): std = sqrt(2/in_f)
    w = jax.random.normal(key, (out_f, in_f), jnp.float32) * math.sqrt(2.0 / in_f)
    wt = jnp.zeros((in_f, out_pad), jnp.float32).at[:, :out_f].set(w.T)
    b = jnp.zeros((1, out_pad), jnp.float32)                 # bias zeroed in __init__
    return wt.astype(jnp.bfloat16), b


def build_params(key, dim_feature, dim_edge, dim_v, num_class, vocab_size):
    dv_pad = _round_up(dim_v, LANE)
    nc_pad = _round_up(num_class, LANE)
    ks = jax.random.split(key, 7)
    p = {"dv_pad": dv_pad, "nc_pad": nc_pad}
    # classifier: Linear(dim_v,256) -> ReLU -> Linear(256,num_class)
    p["cls_w1"], p["cls_b1"] = kaiming_linear(ks[0], dim_v, HIDDEN, HIDDEN)
    p["cls_w2"], p["cls_b2"] = kaiming_linear(ks[1], HIDDEN, num_class, nc_pad)
    # map_node_feat_to_v: Linear(dim_feature,256) -> ReLU -> Linear(256,dim_v)
    p["node_w1"], p["node_b1"] = kaiming_linear(ks[2], dim_feature, HIDDEN, HIDDEN)
    p["node_w2"], p["node_b2"] = kaiming_linear(ks[3], HIDDEN, dim_v, dv_pad)
    # map_edge_feat_to_v: Linear(dim_edge,256) -> ReLU -> Linear(256,dim_v)
    p["edge_w1"], p["edge_b1"] = kaiming_linear(ks[4], dim_edge, HIDDEN, HIDDEN)
    p["edge_w2"], p["edge_b2"] = kaiming_linear(ks[5], HIDDEN, dim_v, dv_pad)
    # word embedding ~ N(0, 1/sqrt(dim_v)); only feeds the external modules.
    p["word_emb"] = jax.random.normal(ks[6], (vocab_size, dim_v), jnp.float32) / math.sqrt(dim_v)
    return p


# ----------------------------------------------------------------------------
# Program interpreter bookkeeping (pure host-side, no device dispatches)
# ----------------------------------------------------------------------------
SKIP_TOKENS = {"<NULL>", "<START>", "<END>", "<UNK>", "unique"}


def _run_program_host(idx_to_prog, prog_host, num_node, dim_v):
    """Reverse-iterate one program; returns the final module output as numpy."""
    saved_output, output = None, None
    for i in range(-1, -len(prog_host) - 1, -1):
        module_type = idx_to_prog[int(prog_host[i])]
        if module_type in SKIP_TOKENS:
            continue
        if module_type == "scene":
            saved_output = output
            output = np.ones((num_node,), np.float32)
            continue
        # External module source unavailable -> eval-mode exception path of the
        # original forward(): output = zeros(dim_v).
        return np.zeros((dim_v,), np.float32)
    if output is None:
        output = np.zeros((dim_v,), np.float32)
    return output


# ----------------------------------------------------------------------------
# XNMNet forward (batch is a Python list, exactly like the PyTorch module)
# ----------------------------------------------------------------------------
def xnmnet_forward(params, vocab, programs, program_inputs, node_feats, edge_feats,
                   dim_feature, dim_edge, dim_v, num_class):
    """
    programs       : list of 1-D int arrays (program token indices)
    program_inputs : list of 1-D int arrays (question token indices)
    node_feats     : list of (num_node, dim_feature) arrays
    edge_feats     : list of (num_node, num_node, dim_edge) arrays
    Returns (logits, node_feat_list, edge_feat_list); the torch module returns
    only logits — the mapped features are returned so the caller can block on
    the full hot path (they would feed the external neural modules).
    """
    idx_to_prog = vocab["program_idx_to_token"]
    batch_size = len(programs)
    dv_pad = params["dv_pad"]
    num_nodes = [int(nf.shape[0]) for nf in node_feats]
    max_nn = max(num_nodes)

    # ---- batched hot path: build compact, row-padded bf16 buffers ON THE HOST
    #      (no device-side cast/pad passes), one Pallas call per MLP ----
    n_rows = batch_size * max_nn
    tm_node, n_rows_pad = _pad_rows(n_rows)
    node_x = np.zeros((n_rows_pad, dim_feature), dtype=jnp.bfloat16)

    e_rows = batch_size * max_nn * max_nn
    tm_edge, e_rows_pad = _pad_rows(e_rows)
    edge_x = np.zeros((e_rows_pad, dim_edge), dtype=jnp.bfloat16)

    for n in range(batch_size):
        nn_ = num_nodes[n]
        node_x[n * max_nn: n * max_nn + nn_, :] = \
            np.asarray(node_feats[n]).astype(jnp.bfloat16)
        blk = edge_x[n * max_nn * max_nn: (n + 1) * max_nn * max_nn]
        blk = blk.reshape(max_nn, max_nn, dim_edge)           # view into edge_x
        blk[:nn_, :nn_, :] = np.asarray(edge_feats[n]).astype(jnp.bfloat16)

    node_v = mlp2(jnp.asarray(node_x),
                  params["node_w1"], params["node_b1"],
                  params["node_w2"], params["node_b2"], tm_node)
    node_v = node_v[:n_rows].reshape(batch_size, max_nn, dv_pad)

    edge_v = mlp2(jnp.asarray(edge_x),
                  params["edge_w1"], params["edge_b1"],
                  params["edge_w2"], params["edge_b2"], tm_edge)
    edge_v = edge_v[:e_rows].reshape(batch_size, max_nn, max_nn, dv_pad)

    # Per-sample views (these would feed the external neural modules).
    node_feat = [node_v[n, :num_nodes[n], :dim_v] for n in range(batch_size)]
    edge_feat = [edge_v[n, :num_nodes[n], :num_nodes[n], :dim_v] for n in range(batch_size)]

    # ---- program interpreter: host-side only (no per-token device dispatch) ----
    outs = []
    for n in range(batch_size):
        out = _run_program_host(idx_to_prog, np.asarray(programs[n]), num_nodes[n], dim_v)
        if out.shape != (dim_v,):
            # A program whose final non-skip module is 'scene' yields a
            # (num_node,) attention vector; the original torch code would crash
            # at torch.stack / classifier here.  Raise explicitly instead of
            # silently mis-slicing.
            raise ValueError(
                f"program {n}: final module output shape {out.shape} != ({dim_v},)")
        outs.append(out)
    final_module_outputs = np.stack(outs)

    # ---- classifier MLP (one Pallas call for the whole batch, f32 logits) ----
    tm_cls, b_pad = _pad_rows(batch_size)
    cls_in = np.zeros((b_pad, dim_v), dtype=jnp.bfloat16)
    cls_in[:batch_size, :] = final_module_outputs.astype(jnp.bfloat16)
    logits = mlp2(jnp.asarray(cls_in),
                  params["cls_w1"], params["cls_b1"],
                  params["cls_w2"], params["cls_b2"], tm_cls,
                  out_dtype=jnp.float32)
    return logits[:batch_size, :num_class], node_feat, edge_feat


# ----------------------------------------------------------------------------
# main
# ----------------------------------------------------------------------------
if __name__ == "__main__":
    batch = 2
    num_node = 8
    dim_feature = 64
    dim_edge = 16
    dim_v = 32
    num_class = 10

    vocab = {
        "question_token_to_idx": {t: i for i, t in enumerate(
            ["<NULL>", "<START>", "<END>", "red", "blue", "cube", "sphere", "left"])},
        "program_idx_to_token": ["<NULL>", "<START>", "<END>", "<UNK>", "unique",
                                 "scene", "filter", "query", "relate", "count"],
    }
    vocab_size = len(vocab["question_token_to_idx"])

    key = jax.random.PRNGKey(0)
    kp, kn, ke = jax.random.split(key, 3)
    params = build_params(kp, dim_feature, dim_edge, dim_v, num_class, vocab_size)

    # deterministic example inputs
    node_feats = [jax.random.normal(jax.random.fold_in(kn, n),
                                    (num_node, dim_feature), jnp.float32)
                  for n in range(batch)]
    edge_feats = [jax.random.normal(jax.random.fold_in(ke, n),
                                    (num_node, num_node, dim_edge), jnp.float32)
                  for n in range(batch)]
    # programs execute in reverse; include 'scene' (implemented) and
    # 'query'/'filter'/'count' (external modules -> eval-mode path, zeros(dim_v))
    programs = [
        jnp.array([1, 7, 6, 5, 2], jnp.int32),   # <START> query filter scene <END>
        jnp.array([1, 9, 5, 2], jnp.int32),      # <START> count scene <END>
    ]
    program_inputs = [
        jnp.array([0, 5, 3, 0, 0], jnp.int32),
        jnp.array([0, 0, 0, 0], jnp.int32),
    ]

    logits, node_feat, edge_feat = xnmnet_forward(
        params, vocab, programs, program_inputs, node_feats, edge_feats,
        dim_feature, dim_edge, dim_v, num_class)
    jax.block_until_ready((logits, node_feat, edge_feat))
    assert logits.shape == (batch, num_class)
    assert logits.dtype == jnp.float32
    assert node_feat[0].shape == (num_node, dim_v)
    assert edge_feat[0].shape == (num_node, num_node, dim_v)
    print("KERNEL_OK")
</pallas_src>

<mosaic_0001>
module attributes {stable_mosaic.version = 11 : i64} {
  func.func @_mlp2_kernel(%arg0: i32, %arg1: memref<16x64xbf16, #tpu.memory_space<vmem>>, %arg2: memref<64x256xbf16, #tpu.memory_space<vmem>>, %arg3: memref<1x256xf32, #tpu.memory_space<vmem>>, %arg4: memref<256x128xbf16, #tpu.memory_space<vmem>>, %arg5: memref<1x128xf32, #tpu.memory_space<vmem>>, %arg6: memref<16x128xbf16, #tpu.memory_space<vmem>>) attributes {dimension_semantics = [#tpu.dimension_semantics<parallel>], iteration_bounds = array<i64: 1>, scalar_prefetch = 0 : i64, scratch_operands = 0 : i64, tpu.core_type = #tpu.core_type<tc>, window_params = [{transform_indices = @transform_0, window_bounds = array<i64: 16, 64>}, {pipeline_mode = #tpu.pipeline_mode<synchronous>, transform_indices = @transform_1, window_bounds = array<i64: 64, 256>}, {pipeline_mode = #tpu.pipeline_mode<synchronous>, transform_indices = @transform_2, window_bounds = array<i64: 1, 256>}, {pipeline_mode = #tpu.pipeline_mode<synchronous>, transform_indices = @transform_3, window_bounds = array<i64: 256, 128>}, {pipeline_mode = #tpu.pipeline_mode<synchronous>, transform_indices = @transform_4, window_bounds = array<i64: 1, 128>}, {transform_indices = @transform_5, window_bounds = array<i64: 16, 128>}]} {
    %c0 = arith.constant 0 : index
    %c0_0 = arith.constant 0 : index
    %0 = vector.load %arg1[%c0, %c0_0] : memref<16x64xbf16, #tpu.memory_space<vmem>>, vector<16x64xbf16>
    %c0_1 = arith.constant 0 : index
    %c0_2 = arith.constant 0 : index
    %1 = vector.load %arg2[%c0_1, %c0_2] : memref<64x256xbf16, #tpu.memory_space<vmem>>, vector<64x256xbf16>
    %cst = arith.constant dense<0.000000e+00> : vector<16x256xf32>
    %2 = tpu.matmul %0, %1, %cst {dimension_numbers = #tpu.dot_dimension_numbers<[1], [0], [0], [1], [0, 0, 1, 1], [], []>} : vector<16x64xbf16>, vector<64x256xbf16>, vector<16x256xf32> -> vector<16x256xf32>
    %c0_3 = arith.constant 0 : index
    %c0_4 = arith.constant 0 : index
    %3 = vector.load %arg3[%c0_3, %c0_4] : memref<1x256xf32, #tpu.memory_space<vmem>>, vector<1x256xf32>
    %4 = vector.broadcast %3 : vector<1x256xf32> to vector<16x256xf32>
    %5 = arith.addf %2, %4 : vector<16x256xf32>
    %cst_5 = arith.constant 0.000000e+00 : f32
    %6 = vector.broadcast %cst_5 : f32 to vector<16x256xf32>
    %7 = arith.maximumf %5, %6 : vector<16x256xf32>
    %8 = arith.truncf %7 : vector<16x256xf32> to vector<16x256xbf16>
    %c0_6 = arith.constant 0 : index
    %c0_7 = arith.constant 0 : index
    %9 = vector.load %arg4[%c0_6, %c0_7] : memref<256x128xbf16, #tpu.memory_space<vmem>>, vector<256x128xbf16>
    %cst_8 = arith.constant dense<0.000000e+00> : vector<16x128xf32>
    %10 = tpu.matmul %8, %9, %cst_8 {dimension_numbers = #tpu.dot_dimension_numbers<[1], [0], [0], [1], [0, 0, 1, 1], [], []>} : vector<16x256xbf16>, vector<256x128xbf16>, vector<16x128xf32> -> vector<16x128xf32>
    %c0_9 = arith.constant 0 : index
    %c0_10 = arith.constant 0 : index
    %11 = vector.load %arg5[%c0_9, %c0_10] : memref<1x128xf32, #tpu.memory_space<vmem>>, vector<1x128xf32>
    %12 = vector.broadcast %11 : vector<1x128xf32> to vector<16x128xf32>
    %13 = arith.addf %10, %12 : vector<16x128xf32>
    %14 = arith.truncf %13 : vector<16x128xf32> to vector<16x128xbf16>
    %c0_11 = arith.constant 0 : index
    %c0_12 = arith.constant 0 : index
    %15 = vector.load %arg6[%c0_11, %c0_12] : memref<16x128xbf16, #tpu.memory_space<vmem>>, vector<16x128xbf16>
    tpu.vector_store %arg6[%c0_11, %c0_12], %14 {strides = array<i32>} : memref<16x128xbf16, #tpu.memory_space<vmem>>, vector<16x128xbf16>,
    return
  }
  func.func @transform_0(%arg0: i32) -> (i32, i32) {
    %c0_i32 = arith.constant 0 : i32
    %c0_i32_0 = arith.constant 0 : i32
    return %arg0, %c0_i32 : i32, i32
  }
  func.func @transform_1(%arg0: i32) -> (i32, i32) {
    %c0_i32 = arith.constant 0 : i32
    %c0_i32_0 = arith.constant 0 : i32
    %c0_i32_1 = arith.constant 0 : i32
    return %c0_i32, %c0_i32_0 : i32, i32
  }
  func.func @transform_2(%arg0: i32) -> (i32, i32) {
    %c0_i32 = arith.constant 0 : i32
    %c0_i32_0 = arith.constant 0 : i32
    %c0_i32_1 = arith.constant 0 : i32
    return %c0_i32, %c0_i32_0 : i32, i32
  }
  func.func @transform_3(%arg0: i32) -> (i32, i32) {
    %c0_i32 = arith.constant 0 : i32
    %c0_i32_0 = arith.constant 0 : i32
    %c0_i32_1 = arith.constant 0 : i32
    return %c0_i32, %c0_i32_0 : i32, i32
  }
  func.func @transform_4(%arg0: i32) -> (i32, i32) {
    %c0_i32 = arith.constant 0 : i32
    %c0_i32_0 = arith.constant 0 : i32
    %c0_i32_1 = arith.constant 0 : i32
    return %c0_i32, %c0_i32_0 : i32, i32
  }
  func.func @transform_5(%arg0: i32) -> (i32, i32) {
    %c0_i32 = arith.constant 0 : i32
    %c0_i32_0 = arith.constant 0 : i32
    return %arg0, %c0_i32 : i32, i32
  }
}

</mosaic_0001>

<bundles_post_ra>
// kernel: tpu_custom_call.1
= control target key start
LH: loop header
LB: loop body
LE: loop exit
PB: predicated region body
PF: predicated region fallthrough
CT: control target
= control target key end

     0   :  { %10 = vsyncpa [#allocation3], 0  ;;  %s679_s0 = inlined_call_operand.hbm [shape: bf16[16,64], index: 0, kind: input, shape index: {}]   ;;  %s680_s1 = inlined_call_operand.hbm [shape: bf16[64,256], index: 1, kind: input, shape index: {}]   ;;  %s681_s2 = inlined_call_operand.vmem [shape: f32[1,256], index: 2, kind: input, shape index: {}]   ;;  %s682_s3 = inlined_call_operand.hbm [shape: bf16[256,128], index: 3, kind: input, shape index: {}]   ;;  %s683_s4 = inlined_call_operand.vmem [shape: f32[1,128], index: 4, kind: input, shape index: {}]   ;;  %s684_s5 = inlined_call_operand.hbm [shape: bf16[16,128], index: 5, kind: output, shape index: {}]  }
   0x1   :  { %11 = vsyncpa [#allocation6], 0 }
   0x2   :  { %12 = vsyncpa [#allocation4], 0  ;;  %s577_s18 = smov [#allocation5]   ;;  %s483_s22 = scalar_lea.hbm %s680_s1, 1024 }
   0x3   :  { %s30_s19 = sshll.u32 %s577_s18, 4  ;;  %p484_p0 = scmp.ne.s32.totalorder %s680_s1, %s483_s22  ;;  %s31_s19 = int_to_ptr.vmem [resolvable:$true] %s30_s19 }
   0x4   :  { %p487_p1 = scmp.lt.u32.totalorder %s483_s22, %s680_s1 }
   0x6   :  { %p489_p2 = pnand %p487_p1, %p484_p0 }
   0x8   :  { %492 = shalt.err (!%p489_p2)
}
   0x9   :  { %s493_s27 = scalar_lea.vmem %s31_s19, 1024  ;;  %p498_p4 = scmp.lt.s32.totalorder %s31_s19, %s31_s19 }
   0xa   :  { %p494_p3 = scmp.ne.s32.totalorder %s31_s19, %s493_s27  ;;  %p499_p5 = scmp.lt.s32.totalorder %s493_s27, %s493_s27 }
   0xc   :  { %p500_p6 = por %p499_p5, %p498_p4 }
   0xe   :  { %p501_p7 = pnand %p500_p6, %p494_p3 }
  0x10   :  { %504 = shalt.err (!%p501_p7)
}
  0x11   :  { %s578_s28 = smov 128   ;;  %s579_s29 = smov 8  }
  0x12   :  { %36 = dma.hbm_to_vmem [thread:$0]  %s680_s1, 1024, %s31_s19, [#allocation6], %s578_s28, %s578_s28, %s579_s29  }
  0x13   :  { %s580_s7 = smov [#allocation2]   ;;  %s505_s11 = scalar_lea.hbm %s679_s0, 128 }
  0x14   :  { %s18_s8 = sshll.u32 %s580_s7, 4  ;;  %p506_p8 = scmp.ne.s32.totalorder %s679_s0, %s505_s11  ;;  %s19_s8 = int_to_ptr.vmem [resolvable:$true] %s18_s8 }
  0x15   :  { %p509_p9 = scmp.lt.u32.totalorder %s505_s11, %s679_s0 }
  0x17   :  { %p511_p10 = pnand %p509_p9, %p506_p8 }
  0x19   :  { %514 = shalt.err (!%p511_p10)
}
  0x1a   :  { %s515_s16 = scalar_lea.vmem %s19_s8, 128  ;;  %p520_p12 = scmp.lt.s32.totalorder %s19_s8, %s19_s8 }
  0x1b   :  { %p516_p11 = scmp.ne.s32.totalorder %s19_s8, %s515_s16  ;;  %p521_p13 = scmp.lt.s32.totalorder %s515_s16, %s515_s16 }
  0x1d   :  { %p522_p0 = por %p521_p13, %p520_p12 }
  0x1f   :  { %p523_p1 = pnand %p522_p0, %p516_p11 }
  0x21   :  { %526 = shalt.err (!%p523_p1)
}
  0x22   :  { %s581_s1 = smov 64   ;;  %s582_s17 = smov 4  }
  0x23   :  { %24 = dma.hbm_to_vmem [thread:$0]  %s679_s0, 128, %s19_s8, [#allocation3], %s581_s1, %s581_s1, %s582_s17  }
  0x24   :  { %s583_s20 = smov [#allocation7]   ;;  %s527_s24 = scalar_lea.hbm %s682_s3, 2048 }
  0x25   :  { %s44_s21 = sshll.u32 %s583_s20, 4  ;;  %p528_p2 = scmp.ne.s32.totalorder %s682_s3, %s527_s24  ;;  %s45_s21 = int_to_ptr.vmem [resolvable:$true] %s44_s21 }
  0x26   :  { %p531_p3 = scmp.lt.u32.totalorder %s527_s24, %s682_s3 }
  0x28   :  { %p533_p4 = pnand %p531_p3, %p528_p2 }
  0x2a   :  { %536 = shalt.err (!%p533_p4)
}
  0x2b   :  { %s537_s29 = scalar_lea.vmem %s45_s21, 2048  ;;  %p542_p6 = scmp.lt.s32.totalorder %s45_s21, %s45_s21 }
  0x2c   :  { %p538_p5 = scmp.ne.s32.totalorder %s45_s21, %s537_s29  ;;  %p543_p7 = scmp.lt.s32.totalorder %s537_s29, %s537_s29 }
  0x2e   :  { %p544_p8 = por %p543_p7, %p542_p6 }
  0x30   :  { %p545_p9 = pnand %p544_p8, %p538_p5 }
  0x32   :  { %548 = shalt.err (!%p545_p9)
}
  0x33   :  { %50 = dma.hbm_to_vmem [thread:$0]  %s682_s3, 2048, %s45_s21, [#allocation6], %s581_s1, %s581_s1, %s582_s17  }
  0x34   :  { %571 = dma.done.wait [#allocation3], 128  }
  0x35   :  { %572 = vsyncadd [#allocation3], 4294967168 }
  0x36   :  { %573 = dma.done.wait [#allocation6], 3072  }
  0x37   :  { %574 = vsyncadd [#allocation6], 4294964224  ;;  %v584_v0 = vmov 0   ;;  %v454_v1 = vld [vmem:[#allocation5 + $0x4] ss:$8 sps:$4 sm:$0xff]   ;;  %v471_v13 = vld [vmem:[#allocation7 + $0x50] sm:$0xff]   ;;  %v75_v26 = vlaneseq }
  0x38   :  { %166 = vmatprep.mubr.bf16.mxu0 %v584_v0  ;;  %v456_v2 = vld [vmem:[#allocation5] ss:$8 sps:$4 sm:$0xff]   ;;  %134 = vmatprep.subr.bf16.mxu0 %v454_v1  ;;  %v457_v3 = vld [vmem:[#allocation5 + $0x14] ss:$8 sps:$4 sm:$0xff]   ;;  %v459_v4 = vld [vmem:[#allocation5 + $0x10] ss:$8 sps:$4 sm:$0xff]  }
  0x39   :  { %135 = vmatpush1.bf16.msra.mxu0 %v456_v2  ;;  %v460_v5 = vld [vmem:[#allocation5 + $0x24] ss:$8 sps:$4 sm:$0xff]   ;;  %v462_v6 = vld [vmem:[#allocation5 + $0x20] ss:$8 sps:$4 sm:$0xff]   ;;  %v463_v7 = vld [vmem:[#allocation5 + $0x34] ss:$8 sps:$4 sm:$0xff]  }
  0x3a   :  { %136 = vmatprep.subr.bf16.mxu0 %v457_v3  ;;  %v467_v8 = vld [vmem:[#allocation7 + $0x40] sm:$0xff]   ;;  %v465_v10 = vld [vmem:[#allocation5 + $0x30] ss:$8 sps:$4 sm:$0xff]   ;;  %v469_v11 = vld [vmem:[#allocation7 + $0x48] sm:$0xff]   ;;  %vm130_vm0 = vcmask 523264   ;;  %v76_v27 = vshrl.u32 %v75_v26, 7 }
  0x3b   :  { %v468_v9 = vld [vmem:[#allocation7] sm:$0xff]   ;;  %423 = vmatprep.subr.bf16.mxu1 %v467_v8  ;;  %v470_v12 = vld [vmem:[#allocation7 + $0x8] sm:$0xff]   ;;  %v466_v14 = vld [vmem:[#allocation2] sm:$0xff]   ;;  %s585_s8 = smov [#allocation8]  }
  0x3c   :  { %424 = vmatpush3.bf16.msra.mxu1 %v468_v9  ;;  %v472_v15 = vld [vmem:[#allocation7 + $0x10] sm:$0xff]   ;;  %v473_v16 = vld [vmem:[#allocation7 + $0x58] sm:$0xff]   ;;  %v475_v18 = vld [vmem:[#allocation7 + $0x60] sm:$0xff]   ;;  %v77_v28 = vsub.s32 0, %v76_v27  ;;  %v81_v30 = vsub.s32 1, %v76_v27  ;;  %s374_s9 = sshll.u32 %s585_s8, 4  ;;  %s375_s9 = int_to_ptr.vmem [resolvable:$true] %s374_s9 }
  0x3d   :  { %137 = vmatpush1.bf16.msra.mxu0 %v459_v4  ;;  %425 = vmatprep.subr.bf16.mxu1 %v469_v11  ;;  %v474_v17 = vld [vmem:[#allocation7 + $0x18] sm:$0xff]   ;;  %v476_v19 = vld [vmem:[#allocation7 + $0x20] sm:$0xff]   ;;  %v477_v20 = vld [vmem:[#allocation7 + $0x68] sm:$0xff]   ;;  %s549_s10 = scalar_lea.vmem %s375_s9, 128  ;;  %p554_p11 = scmp.lt.s32.totalorder %s375_s9, %s375_s9 }
  0x3e   :  { %138 = vmatprep.subr.bf16.mxu0 %v460_v5  ;;  %v478_v21 = vld [vmem:[#allocation7 + $0x28] sm:$0xff]   ;;  %v479_v22 = vld [vmem:[#allocation7 + $0x70] sm:$0xff]   ;;  %v481_v24 = vld [vmem:[#allocation7 + $0x78] sm:$0xff]   ;;  %p550_p10 = scmp.ne.s32.totalorder %s375_s9, %s549_s10  ;;  %p555_p12 = scmp.lt.s32.totalorder %s549_s10, %s549_s10 }
  0x3f   :  { %v480_v23 = vld [vmem:[#allocation7 + $0x30] sm:$0xff]   ;;  %v482_v25 = vld [vmem:[#allocation7 + $0x38] sm:$0xff]  }
  0x40   :  { %426 = vmatpush3.bf16.msra.mxu1 %v470_v12  ;;  %v73_v29 = vld [vmem:[%s681_s2] sm:$0x3]  ;;  %p556_p13 = por %p555_p12, %p554_p11 }
  0x41   :  { %139 = vmatpush1.bf16.msra.mxu0 %v462_v6  ;;  %427 = vmatprep.subr.bf16.mxu1 %v471_v13  ;;  %v78_v31 = vrot.slane %v73_v29, %v77_v28  ;;  %v82_v32 = vrot.slane %v73_v29, %v81_v30  ;;  %v397_v51 = vld [vmem:[%s683_s4] ss:$0 sm:$0xff] }
  0x42   :  { %140 = vmatprep.subr.bf16.mxu0 %v463_v7  ;;  %p557_p0 = pnand %p556_p13, %p550_p10 }
  0x44   :  { %428 = vmatpush3.bf16.msra.mxu1 %v472_v15 }
  0x45   :  { %141 = vmatpush1.bf16.msra.mxu0 %v465_v10  ;;  %429 = vmatprep.subr.bf16.mxu1 %v473_v16 }
  0x48   :  { %396 = vmatmul.mubr.msk.bf16.vlgmr.msra.gmra.mrb[0].mxu0 %vm130_vm0, %v466_v14  ;;  %430 = vmatpush3.bf16.msra.mxu1 %v474_v17 }
  0x49   :  { %431 = vmatprep.subr.bf16.mxu1 %v475_v18 }
  0x4c   :  { %432 = vmatpush3.bf16.msra.mxu1 %v476_v19 }
  0x4d   :  { %433 = vmatprep.subr.bf16.mxu1 %v477_v20 }
  0x50   :  { %434 = vmatpush3.bf16.msra.mxu1 %v478_v21 }
  0x51   :  { %435 = vmatprep.subr.bf16.mxu1 %v479_v22 }
  0x54   :  { %436 = vmatpush3.bf16.msra.mxu1 %v480_v23 }
  0x55   :  { %437 = vmatprep.subr.bf16.mxu1 %v481_v24 }
  0x58   :  { %438 = vmatpush3.bf16.msra.mxu1 %v482_v25 }
 0x11b   :  { %v168_v33 = vpop.f32.mrb[0].mxu0 }
 0x11c   :  { %v169_v34 = vadd.f32 %v168_v33, %v78_v31  ;;  %v170_v35 = vpop.f32.mrb[1].mxu0 }
 0x11d   :  { %v171_v36 = vadd.f32 %v170_v35, %v82_v32  ;;  %v172_v37 = vpop.f32.mrb[2].mxu0 }
 0x11e   :  { %v173_v38 = vadd.f32 %v172_v37, %v78_v31  ;;  %v174_v39 = vpop.f32.mrb[3].mxu0  ;;  %v177_v41 = vmax.f32 %v169_v34, 0.0 }
 0x11f   :  { %v175_v40 = vadd.f32 %v174_v39, %v82_v32  ;;  %v178_v43 = vmax.f32 %v171_v36, 0.0 }
 0x120   :  { %v179_v42 = vmax.f32 %v173_v38, 0.0 }
 0x121   :  { %v180_v44 = vmax.f32 %v175_v40, 0.0 }
 0x122   :  { %v181_v45 = vpack.c.bf16 %v179_v42, %v177_v41 }
 0x123   :  { %v182_v46 = vpack.c.bf16 %v180_v44, %v178_v43 }
 0x125   :  { %350 = vmatprep.mubr.bf16.mxu1 %v182_v46 }
 0x126   :  { %351 = vmatmul.mubr.bf16.vlgmr.msra.gmra.mrb[0].mxu1 %v181_v45 }
 0x1f9   :  { %v439_v47 = vpop.f32.mrb[0].mxu1 }
 0x1fa   :  { %v440_v48 = vpop.f32.mrb[1].mxu1 }
 0x1fb   :  { %v441_v49 = vadd.f32 %v440_v48, %v439_v47  ;;  %v442_v50 = vpop.f32.mrb[2].mxu1 }
 0x1fc   :  { %v443_v52 = vpop.f32.mrb[3].mxu1 }
 0x1fd   :  { %v444_v53 = vadd.f32 %v443_v52, %v442_v50  ;;  %v353_v54 = vadd.f32 %v441_v49, %v397_v51 }
 0x1ff   :  { %v356_v55 = vadd.f32 %v444_v53, %v397_v51 }
 0x201   :  { %v421_v56 = vpack.c.bf16 %v356_v55, %v353_v54 }
 0x203   :  { %422 = vst [vmem:[#allocation8] sm:$0xff] %v421_v56  }
 0x204   :  { %560 = shalt.err (!%p557_p0)
}
 0x205   :  { %s561_s4 = scalar_lea.hbm %s684_s5, 128 }
 0x206   :  { %p562_p1 = scmp.ne.s32.totalorder %s684_s5, %s561_s4  ;;  %p565_p2 = scmp.lt.u32.totalorder %s561_s4, %s684_s5 }
 0x208   :  { %p567_p3 = pnand %p565_p2, %p562_p1 }
 0x20a   :  { %570 = shalt.err (!%p567_p3)
}
 0x20b   :  { %380 = dma.vmem_to_hbm [thread:$0]  %s375_s9, 128, %s684_s5, [#allocation4], %s581_s1, %s581_s1, %s582_s17  }
 0x20c   :  { %575 = dma.done.wait [#allocation4], 128  }
 0x20d   :  { %576 = vsyncadd [#allocation4], 4294967168 }
 0x20e   :  { %384 = vsyncpa [#allocation3], 1 }
 0x20f   :  { %385 = vsyncpa [#allocation6], 1 }
 0x210   :  { %386 = vsyncpa [#allocation4], 1 }

</bundles_post_ra>
